<compile_context>
chip_gen: v7x
topology: tpu7x:2x2x1
jax: 0.10.0
libtpu: 0.0.40
codegen_flags: <defaults>
</compile_context>

<pallas_src>
import functools

import jax
import jax.numpy as jnp
from jax import lax
from jax.experimental import pallas as pl
from jax.experimental.pallas import tpu as pltpu


def _conv_tap_kernel(x_ref, w_ref, o_ref, acc_ref, *, ho, wo, kw_cols):
    """One kd tap (grid axis 2) of one (n, do) output plane.

    x_ref:   (Hh, 2, Wo, 3*Cin)  bf16 kw-folded, H-parity-split input slab for
             the depth plane dp = 2*do + a.
    w_ref:   (9, 3*Cin, Cout)    bf16 weight, VMEM-resident (constant index).
    o_ref:   (Ho*Wo, Cout)       output plane (written on the last tap only).
    acc_ref: (Ho*Wo, Cout) f32   accumulator across the 3 kd taps.
    """
    a = pl.program_id(2)

    @pl.when(a == 0)
    def _init():
        acc_ref[...] = jnp.zeros_like(acc_ref)

    for b in range(3):                              # kh taps, folded in-kernel
        # Padded-H row b + 2*ho lives at (hh = b//2 + ho, parity = b % 2) in
        # the (Hh, 2) split -> a static slice of the resident slab.
        piece = x_ref[b // 2:b // 2 + ho, b % 2:b % 2 + 1]   # (Ho, 1, Wo, 3Cin)
        piece = piece.reshape(ho * wo, kw_cols)              # (Ho*Wo, 3*Cin)
        w_ab = w_ref[a * 3 + b]                               # (3*Cin, Cout)
        acc_ref[...] += jnp.dot(piece, w_ab,
                                preferred_element_type=jnp.float32)

    @pl.when(a == pl.num_programs(2) - 1)
    def _store():
        o_ref[...] = acc_ref[...].astype(o_ref.dtype)


def downsampling_forward(x_ncdhw, weight_oidhw, stride=2, padding=1,
                         dropout_rate=None, *, compute_dtype=jnp.bfloat16,
                         single_buffer_weight=True):
    """Equivalent of DownSampling.forward (dropout_rate=None -> conv only)."""
    # TODO(synk): Dropout3d branch (dropout_rate is not None) not implemented;
    # it would need pltpu.prng_seed/prng_random_bits for channel-wise masking.
    assert dropout_rate is None
    assert stride == 2 and padding == 1, "specialised to the module defaults"

    N, Cin, D, H, W = x_ncdhw.shape
    Cout, Cin_w, kd, kh, kw = weight_oidhw.shape
    assert Cin == Cin_w and (kd, kh, kw) == (3, 3, 3)

    Do = (D + 2 * padding - kd) // stride + 1
    Ho = (H + 2 * padding - kh) // stride + 1
    Wo = (W + 2 * padding - kw) // stride + 1
    Kw = kw * Cin                       # contraction width per kh tap (3*Cin)
    out_dtype = x_ncdhw.dtype

    # ---- XLA-side prep: ONE layout pass over the input ---------------------
    # NCDHW -> NDHWC, zero-pad, fold the 3 kw taps into the channel dim and
    # split the padded H axis into (Hh, parity).  This (~1.5x padded input) is
    # the only activation tensor the kernel reads.
    x = jnp.transpose(x_ncdhw, (0, 2, 3, 4, 1)).astype(compute_dtype)
    pad_h_hi = padding + (H % 2)        # keep the padded H extent even
    xp = jnp.pad(x, ((0, 0), (padding, padding), (padding, pad_h_hi),
                     (padding, padding), (0, 0)))
    Dp = D + 2 * padding
    Hp = H + padding + pad_h_hi
    Hh = Hp // 2                        # == Ho + 1
    # kw fold: channel j = c*Cin + cin holds tap (kw=c) for output column wo;
    # zero padding is preserved so padded taps contribute zero.
    xcol = jnp.concatenate(
        [xp[:, :, :, c:c + 2 * (Wo - 1) + 1:2, :] for c in range(3)], axis=-1)
    xcol = xcol.reshape(N, Dp, Hh, 2, Wo, Kw)

    # Weight (Cout, Cin, kd, kh, kw) -> (kd*kh, kw*Cin, Cout); row (a, b),
    # column c*Cin + cin, matching the xcol channel ordering.
    wmat = jnp.transpose(weight_oidhw, (2, 3, 4, 1, 0)).reshape(
        kd * kh, Kw, Cout).astype(compute_dtype)

    # ---- VMEM budget / compiler params (generation-aware) ------------------
    itemsize_c = jnp.dtype(compute_dtype).itemsize
    itemsize_o = jnp.dtype(out_dtype).itemsize
    x_blk_bytes = Hh * 2 * Wo * Kw * itemsize_c
    w_bytes = kd * kh * Kw * Cout * itemsize_c
    o_blk_bytes = Ho * Wo * Cout * itemsize_o
    acc_bytes = Ho * Wo * Cout * 4
    need = (2 * x_blk_bytes + (1 if single_buffer_weight else 2) * w_bytes
            + 2 * o_blk_bytes + acc_bytes)
    try:
        vmem_cap = pltpu.get_tpu_info().vmem_capacity_bytes
    except Exception:                   # info query unavailable -> be safe
        vmem_cap = 64 * 1024 * 1024
    vmem_limit = int(min(max(2 * need + (4 << 20), 32 << 20),
                         vmem_cap - (2 << 20)))

    cost = pl.CostEstimate(
        flops=2 * N * Do * Ho * Wo * kd * kh * Kw * Cout,
        transcendentals=0,
        bytes_accessed=(N * Do * kd * x_blk_bytes + w_bytes
                        + N * Do * o_blk_bytes),
    )

    # ---- BlockSpecs ---------------------------------------------------------
    x_spec = pl.BlockSpec(
        (None, None, Hh, 2, Wo, Kw),
        lambda n, do, a: (n, 2 * do + a, 0, 0, 0, 0))
    w_shape = (kd * kh, Kw, Cout)
    w_index = lambda n, do, a: (0, 0, 0)
    if single_buffer_weight:
        try:
            w_spec = pl.BlockSpec(w_shape, w_index,
                                  pipeline_mode=pl.Buffered(1))
        except TypeError:               # pipeline_mode kwarg unavailable
            w_spec = pl.BlockSpec(w_shape, w_index)
    else:
        w_spec = pl.BlockSpec(w_shape, w_index)
    o_spec = pl.BlockSpec((None, None, Ho * Wo, Cout),
                          lambda n, do, a: (n, do, 0, 0))

    kernel = functools.partial(_conv_tap_kernel, ho=Ho, wo=Wo, kw_cols=Kw)
    out_flat = pl.pallas_call(
        kernel,
        out_shape=jax.ShapeDtypeStruct((N, Do, Ho * Wo, Cout), out_dtype),
        grid_spec=pltpu.PrefetchScalarGridSpec(
            num_scalar_prefetch=0,
            grid=(N, Do, kd),
            in_specs=[x_spec, w_spec],
            out_specs=o_spec,
            scratch_shapes=[pltpu.VMEM((Ho * Wo, Cout), jnp.float32)],
        ),
        compiler_params=pltpu.CompilerParams(
            dimension_semantics=("parallel", "parallel", "arbitrary"),
            vmem_limit_bytes=vmem_limit,
        ),
        cost_estimate=cost,
    )(xcol, wmat)

    # (N, Do, Ho*Wo, Cout) -> NCDHW; the only output-side XLA pass.
    out = out_flat.reshape(N, Do, Ho, Wo, Cout)
    return jnp.transpose(out, (0, 4, 1, 2, 3))


if __name__ == "__main__":
    # Small shapes consistent with a Conv3d downsampling block.
    N, Cin, Cout = 2, 4, 8
    D = H = W = 16

    key = jax.random.PRNGKey(0)
    kx, kw_key = jax.random.split(key)
    x = jax.random.normal(kx, (N, Cin, D, H, W), dtype=jnp.float32)
    # nn.Conv3d weight shape (O, I, kd, kh, kw), bias=False as in the module.
    weight = 0.1 * jax.random.normal(kw_key, (Cout, Cin, 3, 3, 3),
                                     dtype=jnp.float32)

    def run(single_buffer_weight):
        fwd = jax.jit(functools.partial(
            downsampling_forward, stride=2, padding=1, dropout_rate=None,
            single_buffer_weight=single_buffer_weight))
        return jax.block_until_ready(fwd(x, weight))

    try:
        out = run(True)
    except Exception:
        # Fallback if this JAX build rejects single-buffered (Buffered(1))
        # BlockSpecs; the constant weight then just keeps the default buffers.
        out = run(False)

    # Reference: XLA conv on the same bf16-rounded operands (the kernel casts
    # its matmul operands to bf16 but accumulates in f32), so the comparison
    # isolates summation-order differences only.
    xq = x.astype(jnp.bfloat16).astype(jnp.float32)
    wq = weight.astype(jnp.bfloat16).astype(jnp.float32)
    ref = lax.conv_general_dilated(
        xq, wq,
        window_strides=(2, 2, 2),
        padding=[(1, 1), (1, 1), (1, 1)],
        dimension_numbers=("NCDHW", "OIDHW", "NCDHW"),
        precision=lax.Precision.HIGHEST,
    )

    assert out.shape == (N, Cout, D // 2, H // 2, W // 2)
    max_err = float(jnp.max(jnp.abs(out - ref)))
    assert jnp.allclose(out, ref, atol=2e-3, rtol=2e-3), max_err

    print("KERNEL_OK")
</pallas_src>

<mosaic_0001>
module attributes {stable_mosaic.version = 11 : i64} {
  func.func @_conv_tap_kernel(%arg0: i32, %arg1: i32, %arg2: i32, %arg3: memref<1x1x9x2x8x12xbf16, #tpu.memory_space<vmem>>, %arg4: memref<9x12x8xbf16, #tpu.memory_space<vmem>>, %arg5: memref<1x1x64x8xf32, #tpu.memory_space<vmem>>, %arg6: memref<64x8xf32, #tpu.memory_space<vmem>>) attributes {dimension_semantics = [#tpu.dimension_semantics<parallel>, #tpu.dimension_semantics<parallel>, #tpu.dimension_semantics<arbitrary>], iteration_bounds = array<i64: 2, 8, 3>, scalar_prefetch = 0 : i64, scratch_operands = 1 : i64, tpu.core_type = #tpu.core_type<tc>, window_params = [{transform_indices = @transform_0, window_bounds = array<i64: 1, 1, 9, 2, 8, 12>}, {pipeline_mode = #tpu.pipeline_mode<synchronous>, transform_indices = @transform_1, window_bounds = array<i64: 9, 12, 8>}, {transform_indices = @transform_2, window_bounds = array<i64: 1, 1, 64, 8>}]} {
    %c0_i32 = arith.constant 0 : i32
    %0 = arith.cmpi eq, %arg2, %c0_i32 : i32
    %1 = arith.extui %0 : i1 to i32
    %c0_i32_0 = arith.constant 0 : i32
    %2 = arith.cmpi ne, %1, %c0_i32_0 : i32
    scf.if %2 {
      %cst_42 = arith.constant 0.000000e+00 : f32
      %42 = vector.broadcast %cst_42 : f32 to vector<64x8xf32>
      %c0_43 = arith.constant 0 : index
      %c0_44 = arith.constant 0 : index
      %43 = vector.load %arg6[%c0_43, %c0_44] : memref<64x8xf32, #tpu.memory_space<vmem>>, vector<64x8xf32>
      tpu.vector_store %arg6[%c0_43, %c0_44], %42 {strides = array<i32>} : memref<64x8xf32, #tpu.memory_space<vmem>>, vector<64x8xf32>,
    } else {
    }
    %c0 = arith.constant 0 : index
    %c0_1 = arith.constant 0 : index
    %c0_2 = arith.constant 0 : index
    %c0_3 = arith.constant 0 : index
    %c0_4 = arith.constant 0 : index
    %c0_5 = arith.constant 0 : index
    %3 = vector.load %arg3[%c0, %c0_1, %c0_2, %c0_3, %c0_4, %c0_5] : memref<1x1x9x2x8x12xbf16, #tpu.memory_space<vmem>>, vector<1x1x8x1x8x12xbf16>
    %4 = vector.shape_cast %3 : vector<1x1x8x1x8x12xbf16> to vector<8x1x8x12xbf16>
    %5 = vector.shape_cast %4 : vector<8x1x8x12xbf16> to vector<64x12xbf16>
    %c3_i32 = arith.constant 3 : i32
    %6 = arith.muli %arg2, %c3_i32 : i32
    %c0_i32_6 = arith.constant 0 : i32
    %7 = arith.addi %6, %c0_i32_6 : i32
    %8 = arith.index_cast %7 : i32 to index
    %c0_7 = arith.constant 0 : index
    %c0_8 = arith.constant 0 : index
    %9 = vector.load %arg4[%8, %c0_7, %c0_8] : memref<9x12x8xbf16, #tpu.memory_space<vmem>>, vector<1x12x8xbf16>
    %10 = vector.shape_cast %9 : vector<1x12x8xbf16> to vector<12x8xbf16>
    %c0_9 = arith.constant 0 : index
    %c0_10 = arith.constant 0 : index
    %11 = vector.load %arg6[%c0_9, %c0_10] : memref<64x8xf32, #tpu.memory_space<vmem>>, vector<64x8xf32>
    %cst = arith.constant dense<0.000000e+00> : vector<64x8xf32>
    %12 = tpu.matmul %5, %10, %cst {dimension_numbers = #tpu.dot_dimension_numbers<[1], [0], [0], [1], [0, 0, 1, 1], [], []>} : vector<64x12xbf16>, vector<12x8xbf16>, vector<64x8xf32> -> vector<64x8xf32>
    %13 = arith.addf %11, %12 : vector<64x8xf32>
    %c0_11 = arith.constant 0 : index
    %c0_12 = arith.constant 0 : index
    %14 = vector.load %arg6[%c0_11, %c0_12] : memref<64x8xf32, #tpu.memory_space<vmem>>, vector<64x8xf32>
    tpu.vector_store %arg6[%c0_11, %c0_12], %13 {strides = array<i32>} : memref<64x8xf32, #tpu.memory_space<vmem>>, vector<64x8xf32>,
    %c0_13 = arith.constant 0 : index
    %c0_14 = arith.constant 0 : index
    %c0_15 = arith.constant 0 : index
    %c1 = arith.constant 1 : index
    %c0_16 = arith.constant 0 : index
    %c0_17 = arith.constant 0 : index
    %15 = vector.load %arg3[%c0_13, %c0_14, %c0_15, %c1, %c0_16, %c0_17] : memref<1x1x9x2x8x12xbf16, #tpu.memory_space<vmem>>, vector<1x1x8x1x8x12xbf16>
    %16 = vector.shape_cast %15 : vector<1x1x8x1x8x12xbf16> to vector<8x1x8x12xbf16>
    %17 = vector.shape_cast %16 : vector<8x1x8x12xbf16> to vector<64x12xbf16>
    %c3_i32_18 = arith.constant 3 : i32
    %18 = arith.muli %arg2, %c3_i32_18 : i32
    %c1_i32 = arith.constant 1 : i32
    %19 = arith.addi %18, %c1_i32 : i32
    %20 = arith.index_cast %19 : i32 to index
    %c0_19 = arith.constant 0 : index
    %c0_20 = arith.constant 0 : index
    %21 = vector.load %arg4[%20, %c0_19, %c0_20] : memref<9x12x8xbf16, #tpu.memory_space<vmem>>, vector<1x12x8xbf16>
    %22 = vector.shape_cast %21 : vector<1x12x8xbf16> to vector<12x8xbf16>
    %c0_21 = arith.constant 0 : index
    %c0_22 = arith.constant 0 : index
    %23 = vector.load %arg6[%c0_21, %c0_22] : memref<64x8xf32, #tpu.memory_space<vmem>>, vector<64x8xf32>
    %cst_23 = arith.constant dense<0.000000e+00> : vector<64x8xf32>
    %24 = tpu.matmul %17, %22, %cst_23 {dimension_numbers = #tpu.dot_dimension_numbers<[1], [0], [0], [1], [0, 0, 1, 1], [], []>} : vector<64x12xbf16>, vector<12x8xbf16>, vector<64x8xf32> -> vector<64x8xf32>
    %25 = arith.addf %23, %24 : vector<64x8xf32>
    %c0_24 = arith.constant 0 : index
    %c0_25 = arith.constant 0 : index
    %26 = vector.load %arg6[%c0_24, %c0_25] : memref<64x8xf32, #tpu.memory_space<vmem>>, vector<64x8xf32>
    tpu.vector_store %arg6[%c0_24, %c0_25], %25 {strides = array<i32>} : memref<64x8xf32, #tpu.memory_space<vmem>>, vector<64x8xf32>,
    %c0_26 = arith.constant 0 : index
    %c0_27 = arith.constant 0 : index
    %c1_28 = arith.constant 1 : index
    %c0_29 = arith.constant 0 : index
    %c0_30 = arith.constant 0 : index
    %c0_31 = arith.constant 0 : index
    %27 = vector.load %arg3[%c0_26, %c0_27, %c1_28, %c0_29, %c0_30, %c0_31] : memref<1x1x9x2x8x12xbf16, #tpu.memory_space<vmem>>, vector<1x1x8x1x8x12xbf16>
    %28 = vector.shape_cast %27 : vector<1x1x8x1x8x12xbf16> to vector<8x1x8x12xbf16>
    %29 = vector.shape_cast %28 : vector<8x1x8x12xbf16> to vector<64x12xbf16>
    %c3_i32_32 = arith.constant 3 : i32
    %30 = arith.muli %arg2, %c3_i32_32 : i32
    %c2_i32 = arith.constant 2 : i32
    %31 = arith.addi %30, %c2_i32 : i32
    %32 = arith.index_cast %31 : i32 to index
    %c0_33 = arith.constant 0 : index
    %c0_34 = arith.constant 0 : index
    %33 = vector.load %arg4[%32, %c0_33, %c0_34] : memref<9x12x8xbf16, #tpu.memory_space<vmem>>, vector<1x12x8xbf16>
    %34 = vector.shape_cast %33 : vector<1x12x8xbf16> to vector<12x8xbf16>
    %c0_35 = arith.constant 0 : index
    %c0_36 = arith.constant 0 : index
    %35 = vector.load %arg6[%c0_35, %c0_36] : memref<64x8xf32, #tpu.memory_space<vmem>>, vector<64x8xf32>
    %cst_37 = arith.constant dense<0.000000e+00> : vector<64x8xf32>
    %36 = tpu.matmul %29, %34, %cst_37 {dimension_numbers = #tpu.dot_dimension_numbers<[1], [0], [0], [1], [0, 0, 1, 1], [], []>} : vector<64x12xbf16>, vector<12x8xbf16>, vector<64x8xf32> -> vector<64x8xf32>
    %37 = arith.addf %35, %36 : vector<64x8xf32>
    %c0_38 = arith.constant 0 : index
    %c0_39 = arith.constant 0 : index
    %38 = vector.load %arg6[%c0_38, %c0_39] : memref<64x8xf32, #tpu.memory_space<vmem>>, vector<64x8xf32>
    tpu.vector_store %arg6[%c0_38, %c0_39], %37 {strides = array<i32>} : memref<64x8xf32, #tpu.memory_space<vmem>>, vector<64x8xf32>,
    %c2_i32_40 = arith.constant 2 : i32
    %39 = arith.cmpi eq, %arg2, %c2_i32_40 : i32
    %40 = arith.extui %39 : i1 to i32
    %c0_i32_41 = arith.constant 0 : i32
    %41 = arith.cmpi ne, %40, %c0_i32_41 : i32
    scf.if %41 {
      %c0_42 = arith.constant 0 : index
      %c0_43 = arith.constant 0 : index
      %42 = vector.load %arg6[%c0_42, %c0_43] : memref<64x8xf32, #tpu.memory_space<vmem>>, vector<64x8xf32>
      %c0_44 = arith.constant 0 : index
      %c0_45 = arith.constant 0 : index
      %c0_46 = arith.constant 0 : index
      %c0_47 = arith.constant 0 : index
      %43 = vector.load %arg5[%c0_44, %c0_45, %c0_46, %c0_47] : memref<1x1x64x8xf32, #tpu.memory_space<vmem>>, vector<1x1x64x8xf32>
      %44 = vector.shape_cast %43 : vector<1x1x64x8xf32> to vector<64x8xf32>
      %45 = vector.shape_cast %42 : vector<64x8xf32> to vector<1x1x64x8xf32>
      tpu.vector_store %arg5[%c0_44, %c0_45, %c0_46, %c0_47], %45 {strides = array<i32>} : memref<1x1x64x8xf32, #tpu.memory_space<vmem>>, vector<1x1x64x8xf32>,
    } else {
    }
    return
  }
  func.func @transform_0(%arg0: i32, %arg1: i32, %arg2: i32) -> (i32, i32, i32, i32, i32, i32) {
    %c2_i32 = arith.constant 2 : i32
    %0 = arith.muli %c2_i32, %arg1 : i32
    %1 = arith.addi %0, %arg2 : i32
    %c0_i32 = arith.constant 0 : i32
    %c0_i32_0 = arith.constant 0 : i32
    %c0_i32_1 = arith.constant 0 : i32
    %c0_i32_2 = arith.constant 0 : i32
    %c0_i32_3 = arith.constant 0 : i32
    return %arg0, %1, %c0_i32, %c0_i32_0, %c0_i32_1, %c0_i32_2 : i32, i32, i32, i32, i32, i32
  }
  func.func @transform_1(%arg0: i32, %arg1: i32, %arg2: i32) -> (i32, i32, i32) {
    %c0_i32 = arith.constant 0 : i32
    %c0_i32_0 = arith.constant 0 : i32
    %c0_i32_1 = arith.constant 0 : i32
    %c0_i32_2 = arith.constant 0 : i32
    return %c0_i32, %c0_i32_0, %c0_i32_1 : i32, i32, i32
  }
  func.func @transform_2(%arg0: i32, %arg1: i32, %arg2: i32) -> (i32, i32, i32, i32) {
    %c0_i32 = arith.constant 0 : i32
    %c0_i32_0 = arith.constant 0 : i32
    %c0_i32_1 = arith.constant 0 : i32
    return %arg0, %arg1, %c0_i32, %c0_i32_0 : i32, i32, i32, i32
  }
}

module attributes {stable_mosaic.version = 11 : i64} {
  func.func @_conv_tap_kernel(%arg0: i32, %arg1: i32, %arg2: i32, %arg3: memref<1x1x9x2x8x12xbf16, #tpu.memory_space<vmem>>, %arg4: memref<9x12x8xbf16, #tpu.memory_space<vmem>>, %arg5: memref<1x1x64x8xf32, #tpu.memory_space<vmem>>, %arg6: memref<64x8xf32, #tpu.memory_space<vmem>>) attributes {dimension_semantics = [#tpu.dimension_semantics<parallel>, #tpu.dimension_semantics<parallel>, #tpu.dimension_semantics<arbitrary>], iteration_bounds = array<i64: 2, 8, 3>, scalar_prefetch = 0 : i64, scratch_operands = 1 : i64, tpu.core_type = #tpu.core_type<tc>, window_params = [{transform_indices = @transform_0, window_bounds = array<i64: 1, 1, 9, 2, 8, 12>}, {pipeline_mode = #tpu.pipeline_mode<synchronous>, transform_indices = @transform_1, window_bounds = array<i64: 9, 12, 8>}, {transform_indices = @transform_2, window_bounds = array<i64: 1, 1, 64, 8>}]} {
    %c0_i32 = arith.constant 0 : i32
    %0 = arith.cmpi eq, %arg2, %c0_i32 : i32
    %1 = arith.extui %0 : i1 to i32
    %c0_i32_0 = arith.constant 0 : i32
    %2 = arith.cmpi ne, %1, %c0_i32_0 : i32
    scf.if %2 {
      %cst_42 = arith.constant 0.000000e+00 : f32
      %42 = vector.broadcast %cst_42 : f32 to vector<64x8xf32>
      %c0_43 = arith.constant 0 : index
      %c0_44 = arith.constant 0 : index
      %43 = vector.load %arg6[%c0_43, %c0_44] : memref<64x8xf32, #tpu.memory_space<vmem>>, vector<64x8xf32>
      tpu.vector_store %arg6[%c0_43, %c0_44], %42 {strides = array<i32>} : memref<64x8xf32, #tpu.memory_space<vmem>>, vector<64x8xf32>,
    } else {
    }
    %c0 = arith.constant 0 : index
    %c0_1 = arith.constant 0 : index
    %c0_2 = arith.constant 0 : index
    %c0_3 = arith.constant 0 : index
    %c0_4 = arith.constant 0 : index
    %c0_5 = arith.constant 0 : index
    %3 = vector.load %arg3[%c0, %c0_1, %c0_2, %c0_3, %c0_4, %c0_5] : memref<1x1x9x2x8x12xbf16, #tpu.memory_space<vmem>>, vector<1x1x8x1x8x12xbf16>
    %4 = vector.shape_cast %3 : vector<1x1x8x1x8x12xbf16> to vector<8x1x8x12xbf16>
    %5 = vector.shape_cast %4 : vector<8x1x8x12xbf16> to vector<64x12xbf16>
    %c3_i32 = arith.constant 3 : i32
    %6 = arith.muli %arg2, %c3_i32 : i32
    %c0_i32_6 = arith.constant 0 : i32
    %7 = arith.addi %6, %c0_i32_6 : i32
    %8 = arith.index_cast %7 : i32 to index
    %c0_7 = arith.constant 0 : index
    %c0_8 = arith.constant 0 : index
    %9 = vector.load %arg4[%8, %c0_7, %c0_8] : memref<9x12x8xbf16, #tpu.memory_space<vmem>>, vector<1x12x8xbf16>
    %10 = vector.shape_cast %9 : vector<1x12x8xbf16> to vector<12x8xbf16>
    %c0_9 = arith.constant 0 : index
    %c0_10 = arith.constant 0 : index
    %11 = vector.load %arg6[%c0_9, %c0_10] : memref<64x8xf32, #tpu.memory_space<vmem>>, vector<64x8xf32>
    %cst = arith.constant dense<0.000000e+00> : vector<64x8xf32>
    %12 = tpu.matmul %5, %10, %cst {dimension_numbers = #tpu.dot_dimension_numbers<[1], [0], [0], [1], [0, 0, 1, 1], [], []>} : vector<64x12xbf16>, vector<12x8xbf16>, vector<64x8xf32> -> vector<64x8xf32>
    %13 = arith.addf %11, %12 : vector<64x8xf32>
    %c0_11 = arith.constant 0 : index
    %c0_12 = arith.constant 0 : index
    %14 = vector.load %arg6[%c0_11, %c0_12] : memref<64x8xf32, #tpu.memory_space<vmem>>, vector<64x8xf32>
    tpu.vector_store %arg6[%c0_11, %c0_12], %13 {strides = array<i32>} : memref<64x8xf32, #tpu.memory_space<vmem>>, vector<64x8xf32>,
    %c0_13 = arith.constant 0 : index
    %c0_14 = arith.constant 0 : index
    %c0_15 = arith.constant 0 : index
    %c1 = arith.constant 1 : index
    %c0_16 = arith.constant 0 : index
    %c0_17 = arith.constant 0 : index
    %15 = vector.load %arg3[%c0_13, %c0_14, %c0_15, %c1, %c0_16, %c0_17] : memref<1x1x9x2x8x12xbf16, #tpu.memory_space<vmem>>, vector<1x1x8x1x8x12xbf16>
    %16 = vector.shape_cast %15 : vector<1x1x8x1x8x12xbf16> to vector<8x1x8x12xbf16>
    %17 = vector.shape_cast %16 : vector<8x1x8x12xbf16> to vector<64x12xbf16>
    %c3_i32_18 = arith.constant 3 : i32
    %18 = arith.muli %arg2, %c3_i32_18 : i32
    %c1_i32 = arith.constant 1 : i32
    %19 = arith.addi %18, %c1_i32 : i32
    %20 = arith.index_cast %19 : i32 to index
    %c0_19 = arith.constant 0 : index
    %c0_20 = arith.constant 0 : index
    %21 = vector.load %arg4[%20, %c0_19, %c0_20] : memref<9x12x8xbf16, #tpu.memory_space<vmem>>, vector<1x12x8xbf16>
    %22 = vector.shape_cast %21 : vector<1x12x8xbf16> to vector<12x8xbf16>
    %c0_21 = arith.constant 0 : index
    %c0_22 = arith.constant 0 : index
    %23 = vector.load %arg6[%c0_21, %c0_22] : memref<64x8xf32, #tpu.memory_space<vmem>>, vector<64x8xf32>
    %cst_23 = arith.constant dense<0.000000e+00> : vector<64x8xf32>
    %24 = tpu.matmul %17, %22, %cst_23 {dimension_numbers = #tpu.dot_dimension_numbers<[1], [0], [0], [1], [0, 0, 1, 1], [], []>} : vector<64x12xbf16>, vector<12x8xbf16>, vector<64x8xf32> -> vector<64x8xf32>
    %25 = arith.addf %23, %24 : vector<64x8xf32>
    %c0_24 = arith.constant 0 : index
    %c0_25 = arith.constant 0 : index
    %26 = vector.load %arg6[%c0_24, %c0_25] : memref<64x8xf32, #tpu.memory_space<vmem>>, vector<64x8xf32>
    tpu.vector_store %arg6[%c0_24, %c0_25], %25 {strides = array<i32>} : memref<64x8xf32, #tpu.memory_space<vmem>>, vector<64x8xf32>,
    %c0_26 = arith.constant 0 : index
    %c0_27 = arith.constant 0 : index
    %c1_28 = arith.constant 1 : index
    %c0_29 = arith.constant 0 : index
    %c0_30 = arith.constant 0 : index
    %c0_31 = arith.constant 0 : index
    %27 = vector.load %arg3[%c0_26, %c0_27, %c1_28, %c0_29, %c0_30, %c0_31] : memref<1x1x9x2x8x12xbf16, #tpu.memory_space<vmem>>, vector<1x1x8x1x8x12xbf16>
    %28 = vector.shape_cast %27 : vector<1x1x8x1x8x12xbf16> to vector<8x1x8x12xbf16>
    %29 = vector.shape_cast %28 : vector<8x1x8x12xbf16> to vector<64x12xbf16>
    %c3_i32_32 = arith.constant 3 : i32
    %30 = arith.muli %arg2, %c3_i32_32 : i32
    %c2_i32 = arith.constant 2 : i32
    %31 = arith.addi %30, %c2_i32 : i32
    %32 = arith.index_cast %31 : i32 to index
    %c0_33 = arith.constant 0 : index
    %c0_34 = arith.constant 0 : index
    %33 = vector.load %arg4[%32, %c0_33, %c0_34] : memref<9x12x8xbf16, #tpu.memory_space<vmem>>, vector<1x12x8xbf16>
    %34 = vector.shape_cast %33 : vector<1x12x8xbf16> to vector<12x8xbf16>
    %c0_35 = arith.constant 0 : index
    %c0_36 = arith.constant 0 : index
    %35 = vector.load %arg6[%c0_35, %c0_36] : memref<64x8xf32, #tpu.memory_space<vmem>>, vector<64x8xf32>
    %cst_37 = arith.constant dense<0.000000e+00> : vector<64x8xf32>
    %36 = tpu.matmul %29, %34, %cst_37 {dimension_numbers = #tpu.dot_dimension_numbers<[1], [0], [0], [1], [0, 0, 1, 1], [], []>} : vector<64x12xbf16>, vector<12x8xbf16>, vector<64x8xf32> -> vector<64x8xf32>
    %37 = arith.addf %35, %36 : vector<64x8xf32>
    %c0_38 = arith.constant 0 : index
    %c0_39 = arith.constant 0 : index
    %38 = vector.load %arg6[%c0_38, %c0_39] : memref<64x8xf32, #tpu.memory_space<vmem>>, vector<64x8xf32>
    tpu.vector_store %arg6[%c0_38, %c0_39], %37 {strides = array<i32>} : memref<64x8xf32, #tpu.memory_space<vmem>>, vector<64x8xf32>,
    %c2_i32_40 = arith.constant 2 : i32
    %39 = arith.cmpi eq, %arg2, %c2_i32_40 : i32
    %40 = arith.extui %39 : i1 to i32
    %c0_i32_41 = arith.constant 0 : i32
    %41 = arith.cmpi ne, %40, %c0_i32_41 : i32
    scf.if %41 {
      %c0_42 = arith.constant 0 : index
      %c0_43 = arith.constant 0 : index
      %42 = vector.load %arg6[%c0_42, %c0_43] : memref<64x8xf32, #tpu.memory_space<vmem>>, vector<64x8xf32>
      %c0_44 = arith.constant 0 : index
      %c0_45 = arith.constant 0 : index
      %c0_46 = arith.constant 0 : index
      %c0_47 = arith.constant 0 : index
      %43 = vector.load %arg5[%c0_44, %c0_45, %c0_46, %c0_47] : memref<1x1x64x8xf32, #tpu.memory_space<vmem>>, vector<1x1x64x8xf32>
      %44 = vector.shape_cast %43 : vector<1x1x64x8xf32> to vector<64x8xf32>
      %45 = vector.shape_cast %42 : vector<64x8xf32> to vector<1x1x64x8xf32>
      tpu.vector_store %arg5[%c0_44, %c0_45, %c0_46, %c0_47], %45 {strides = array<i32>} : memref<1x1x64x8xf32, #tpu.memory_space<vmem>>, vector<1x1x64x8xf32>,
    } else {
    }
    return
  }
  func.func @transform_0(%arg0: i32, %arg1: i32, %arg2: i32) -> (i32, i32, i32, i32, i32, i32) {
    %c2_i32 = arith.constant 2 : i32
    %0 = arith.muli %c2_i32, %arg1 : i32
    %1 = arith.addi %0, %arg2 : i32
    %c0_i32 = arith.constant 0 : i32
    %c0_i32_0 = arith.constant 0 : i32
    %c0_i32_1 = arith.constant 0 : i32
    %c0_i32_2 = arith.constant 0 : i32
    %c0_i32_3 = arith.constant 0 : i32
    return %arg0, %1, %c0_i32, %c0_i32_0, %c0_i32_1, %c0_i32_2 : i32, i32, i32, i32, i32, i32
  }
  func.func @transform_1(%arg0: i32, %arg1: i32, %arg2: i32) -> (i32, i32, i32) {
    %c0_i32 = arith.constant 0 : i32
    %c0_i32_0 = arith.constant 0 : i32
    %c0_i32_1 = arith.constant 0 : i32
    %c0_i32_2 = arith.constant 0 : i32
    return %c0_i32, %c0_i32_0, %c0_i32_1 : i32, i32, i32
  }
  func.func @transform_2(%arg0: i32, %arg1: i32, %arg2: i32) -> (i32, i32, i32, i32) {
    %c0_i32 = arith.constant 0 : i32
    %c0_i32_0 = arith.constant 0 : i32
    %c0_i32_1 = arith.constant 0 : i32
    return %arg0, %arg1, %c0_i32, %c0_i32_0 : i32, i32, i32, i32
  }
}

</mosaic_0001>

<bundles_post_ra>
// kernel: downsampling_forward.1
= control target key start
LH: loop header
LB: loop body
LE: loop exit
PB: predicated region body
PF: predicated region fallthrough
CT: control target
= control target key end

     0   :  { %s1045_s9 = smov 0   ;;  %s1047_s10 = smov 0   ;;  %s1203_s0 = inlined_call_operand.vmem [shape: bf16[2,18,9,2,8,12], index: 0, kind: input, shape index: {}]   ;;  %s1204_s1 = inlined_call_operand.vmem [shape: bf16[9,12,8], index: 1, kind: input, shape index: {}]   ;;  %s1205_s2 = inlined_call_operand.vmem [shape: f32[2,8,64,8], index: 2, kind: output, shape index: {}]  }
   0x1   :  { %s1049_s11 = smov 0   ;;  %s1051_s12 = smov 0  }
   0x2   :  { %s1053_s13 = smov 0   ;;  %s1055_s14 = smov 0  }
   0x3   :  { %s1057_s15 = smov 0  }
   0x4 LB: > { %s24_s16 = sadd.s32 1, %s1015_s12  ;;  %s27_s17 = sadd.s32 1, %s1019_s13  ;;  %s1027_s15 = sphi %s1057_s15, %s12_s15   ;;  %s1023_s14 = sphi %s1055_s14, %s1211_s14   ;;  %s1019_s13 = sphi %s1053_s13, %s1210_s13   ;;  %s1015_s12 = sphi %s1051_s12, %s1209_s12   ;;  %s1011_s11 = sphi %s1049_s11, %s1208_s11   ;;  %s1007_s10 = sphi %s1047_s10, %s1207_s10   ;;  %s1003_s9 = sphi %s1045_s9, %s1206_s9  }
   0x5   : > { %p25_p0 = scmp.ge.s32.totalorder %s24_s16, 3  ;;  %p786_p1 = scmp.ge.s32.totalorder %s1027_s15, 1 }
   0x6   : > { %p147_p2 = scmp.lt.s32.totalorder %s1027_s15, 49  ;;  %s31_s18 = sadd.s32 1, %s1023_s14 }
   0x7   : > { %s1213_s16 = smov (%p25_p0, %s24_s16), 0  ;;  %s1215_s17 = smov (!%p25_p0, %s27_s17), %s1019_s13 }
   0x8   : > { %p148_p3 = pnand %p786_p1, %p147_p2  ;;  %p29_p4 = scmp.ge.s32.totalorder %s1215_s17, 8 }
   0x9   : > { %s787_s19 = sshll.u32 (!%p148_p3), %s1007_s10, 1  ;;  %p181_p6 = scmp.lt.s32.totalorder (!%p148_p3), %s1011_s11, 1 }
   0xa   : > { %s1217_s17 = smov (%p29_p4, %s1215_s17), 0  ;;  %s1219_s18 = smov (!%p29_p4, %s31_s18), %s1023_s14 }
   0xb   : > { %p33_p5 = scmp.ge.s32.totalorder %s1219_s18, 2  ;;  %151 = sbr.rel (%p148_p3) target bundleno = 288 (0x120), region = 28 }
   0xc   : > { %s180_s20 = sadd.s32 (!%p148_p3), %s1003_s9, %s787_s19  ;;  %p194_p7 = scmp.lt.s32.totalorder (!%p148_p3), %s1007_s10, 7 }
   0xd   : > { %s1221_s18 = smov (%p33_p5, %s1219_s18), 0  ;;  %p183_p8 = scmp.lt.s32.totalorder (!%p148_p3), %s180_s20, 17 }
   0xe   : > { %p792_p9 = scmp.ne.s32.totalorder (!%p148_p3), %s1003_s9, 0 }
  0x12   : > { %s1223_s11 = smov (!%p181_p6, %s1011_s11), 1  ;;  %s1225_s20 = smov (!%p183_p8, %s180_s20), 17 }
  0x13   : > { %s900_s21 = smul.u32 324, %s1223_s11  ;;  %s790_s22 = sshll.u32 %s1223_s11, 6  ;;  %vm206_vm0 = vcmask (!%p792_p9), 64512   ;;  %v1029_v0 = vmov (!%p792_p9), 0.0  }
  0x14   : > { %s1227_s10 = smov (!%p194_p7, %s1007_s10), 7  ;;  %s899_s23 = smul.u32 18, %s1225_s20  ;;  %207 = vst.msk [vmem:[#allocation2] sm:$0xff] (!%p792_p9), %vm206_vm0, %v1029_v0  ;;  %208 = vst.msk [vmem:[#allocation2 + $0x8] sm:$0xff] (!%p792_p9), %vm206_vm0, %v1029_v0 }
  0x15   : > { %s789_s24 = sshll.u32 %s1227_s10, 3  ;;  %205 = sbr.rel (%p792_p9) target bundleno = 28 (0x1c), region = 32  ;;  %209 = vst.msk [vmem:[#allocation2 + $0x10] sm:$0xff] (!%p792_p9), %vm206_vm0, %v1029_v0  ;;  %210 = vst.msk [vmem:[#allocation2 + $0x18] sm:$0xff] (!%p792_p9), %vm206_vm0, %v1029_v0 }
  0x16   : > { %s187_s25 = sadd.s32 %s900_s21, %s899_s23  ;;  %s198_s26 = sadd.s32 %s790_s22, %s789_s24  ;;  %211 = vst.msk [vmem:[#allocation2 + $0x20] sm:$0xff] (!%p792_p9), %vm206_vm0, %v1029_v0  ;;  %212 = vst.msk [vmem:[#allocation2 + $0x28] sm:$0xff] (!%p792_p9), %vm206_vm0, %v1029_v0 }
  0x17   : > { %s788_s27 = sshll.u32 %s187_s25, 2  ;;  %s791_s28 = sshll.u32 %s198_s26, 3  ;;  %213 = vst.msk [vmem:[#allocation2 + $0x30] sm:$0xff] (!%p792_p9), %vm206_vm0, %v1029_v0  ;;  %214 = vst.msk [vmem:[#allocation2 + $0x38] sm:$0xff] (!%p792_p9), %vm206_vm0, %v1029_v0 }
  0x18   : > { %s1098_s3 = scalar_lea.vmem %s1203_s0, %s788_s27  ;;  %s1103_s6 = scalar_lea.vmem %s1205_s2, %s791_s28 }
  0x1c PF: > { %s847_s7 = smul.u32 24, %s1003_s9  ;;  %vm275_vm1 = vcmask 1045504   ;;  %v959_v1 = vld [vmem:[%s1098_s3] ss:$8 sps:$4 sm:$0xff]   ;;  %vm262_vm2 = vcmask 97280   ;;  %v231_v19 = vld [vmem:[#allocation2 + $0x10] sm:$0xff] }
  0x1d   : > { %v960_v2 = vld [vmem:[%s1098_s3 + $0x20] ss:$8 sps:$4 sm:$0xff]   ;;  %865 = vmatprep.mubr.msk.bf16.mxu0 %vm262_vm2, %v959_v1  ;;  %v961_v4 = vld [vmem:[%s1098_s3 + $0x10] ss:$8 sps:$4 sm:$0xff]   ;;  %v964_v8 = vld [vmem:[%s1098_s3 + $0x4] ss:$8 sps:$4 sm:$0xff]  }
  0x1e   : > { %s226_s11 = scalar_lea.vmem %s1204_s1, %s847_s7  ;;  %869 = vmatprep.mubr.msk.bf16.mxu1 %vm262_vm2, %v960_v2  ;;  %v962_v6 = vld [vmem:[%s1098_s3 + $0x30] ss:$8 sps:$4 sm:$0xff]   ;;  %v965_v11 = vld [vmem:[%s1098_s3 + $0x14] ss:$8 sps:$4 sm:$0xff]   ;;  %v967_v14 = vld [vmem:[%s1098_s3 + $0x24] ss:$8 sps:$4 sm:$0xff]  }
  0x1f   : > { %v958_v3 = vld [vmem:[%s226_s11] sm:$0x3f]   ;;  %v963_v7 = vld [vmem:[%s226_s11 + $0x8] sm:$0x3f]   ;;  %v966_v10 = vld [vmem:[%s226_s11 + $0x10] sm:$0x3f]  }
  0x20   : > { %895 = vmatprep.subr.msk.bf16.mxu0 %vm275_vm1, %v958_v3  ;;  %896 = vmatprep.subr.msk.bf16.mxu1 %vm275_vm1, %v958_v3  ;;  %v277_v5 = vsel %vm275_vm1, %v958_v3, 0  ;;  %v422_v9 = vsel %vm275_vm1, %v963_v7, 0  ;;  %v566_v12 = vsel %vm275_vm1, %v966_v10, 0  ;;  %v968_v13 = vld [vmem:[%s1098_s3 + $0x8] ss:$8 sps:$4 sm:$0xff]   ;;  %v229_v21 = vld [vmem:[#allocation2] sm:$0xff] }
  0x21   : > { %864 = vmatpush3.bf16.msra.mxu0 %v277_v5  ;;  %894 = vmatpush3.bf16.msra.mxu1 %v277_v5  ;;  %v970_v15 = vld [vmem:[%s1098_s3 + $0x18] ss:$8 sps:$4 sm:$0xff]   ;;  %v971_v16 = vld [vmem:[%s1098_s3 + $0x28] ss:$8 sps:$4 sm:$0xff]   ;;  %v969_v17 = vld [vmem:[%s1098_s3 + $0x34] ss:$8 sps:$4 sm:$0xff]  }
  0x22   : > { %897 = vmatprep.subr.msk.bf16.mxu1 %vm275_vm1, %v963_v7  ;;  %898 = vmatprep.subr.msk.bf16.mxu0 %vm275_vm1, %v966_v10  ;;  %v972_v18 = vld [vmem:[%s1098_s3 + $0x38] ss:$8 sps:$4 sm:$0xff]   ;;  %v235_v20 = vld [vmem:[#allocation2 + $0x30] sm:$0xff]  ;;  %vm352_vm3 = vcmask 64512   ;;  %v230_v31 = vld [vmem:[#allocation2 + $0x8] sm:$0xff]  ;;  %p844_p10 = scmp.ne.s32.totalorder %s1003_s9, 2 }
  0x23   : > { %v233_v22 = vld [vmem:[#allocation2 + $0x20] sm:$0xff]  ;;  %v232_v25 = vld [vmem:[#allocation2 + $0x18] sm:$0xff]  ;;  %v234_v32 = vld [vmem:[#allocation2 + $0x28] sm:$0xff] }
  0x24   : > { %866 = vmatmul.mubr.msk.bf16.vlgmr.msra.gmra.mrb[0].mxu0 %vm262_vm2, %v961_v4  ;;  %870 = vmatmul.mubr.msk.bf16.vlgmr.msra.gmra.mrb[0].mxu1 %vm262_vm2, %v962_v6  ;;  %v236_v26 = vld [vmem:[#allocation2 + $0x38] sm:$0xff] }
  0x25   : > { %874 = vmatpush3.bf16.msra.mxu1 %v422_v9  ;;  %875 = vmatprep.mubr.msk.bf16.mxu1 %vm262_vm2, %v964_v8 }
  0x26   : > { %884 = vmatpush3.bf16.msra.mxu0 %v566_v12  ;;  %885 = vmatprep.mubr.msk.bf16.mxu0 %vm262_vm2, %v968_v13 }
  0x2c   : > { %876 = vmatmul.mubr.msk.bf16.vlgmr.msra.gmra.mrb[4].mxu1 %vm262_vm2, %v965_v11  ;;  %886 = vmatmul.mubr.msk.bf16.vlgmr.msra.gmra.mrb[4].mxu0 %vm262_vm2, %v970_v15 }
  0x2d   : > { %879 = vmatprep.mubr.msk.bf16.mxu1 %vm262_vm2, %v967_v14  ;;  %889 = vmatprep.mubr.msk.bf16.mxu0 %vm262_vm2, %v971_v16 }
  0x34   : > { %880 = vmatmul.mubr.msk.bf16.gmra.mrb[8].mxu1 %vm262_vm2, %v969_v17  ;;  %890 = vmatmul.mubr.msk.bf16.gmra.mrb[8].mxu0 %vm262_vm2, %v972_v18 }
  0xf7   : > { %v867_v23 = vpop.f32.mrb[0].mxu0  ;;  %v871_v24 = vpop.f32.mrb[0].mxu1 }
  0xf8   : > { %v346_v27 = vadd.f32 %v867_v23, %v231_v19  ;;  %v350_v28 = vadd.f32 %v871_v24, %v235_v20  ;;  %v313_v29 = vpop.f32.mrb[1].mxu0  ;;  %v329_v30 = vpop.f32.mrb[1].mxu1 }
  0xf9   : > { %v344_v33 = vadd.f32 %v313_v29, %v229_v21  ;;  %v348_v34 = vadd.f32 %v329_v30, %v233_v22  ;;  %v868_v35 = vpop.f32.mrb[2].mxu0  ;;  %v872_v36 = vpop.f32.mrb[2].mxu1 }
  0xfa   : > { %355 = vst.msk [vmem:[#allocation2 + $0x10] sm:$0xff] %vm352_vm3, %v346_v27  ;;  %359 = vst.msk [vmem:[#allocation2 + $0x30] sm:$0xff] %vm352_vm3, %v350_v28  ;;  %v347_v37 = vadd.f32 %v868_v35, %v232_v25  ;;  %v351_v38 = vadd.f32 %v872_v36, %v236_v26  ;;  %v316_v39 = vpop.f32.mrb[3].mxu0  ;;  %v332_v40 = vpop.f32.mrb[3].mxu1 }
  0xfb   : > { %353 = vst.msk [vmem:[#allocation2] sm:$0xff] %vm352_vm3, %v344_v33  ;;  %357 = vst.msk [vmem:[#allocation2 + $0x20] sm:$0xff] %vm352_vm3, %v348_v34  ;;  %v345_v41 = vadd.f32 %v316_v39, %v230_v31  ;;  %v349_v42 = vadd.f32 %v332_v40, %v234_v32 }
  0xfc   : > { %356 = vst.msk [vmem:[#allocation2 + $0x18] sm:$0xff] %vm352_vm3, %v347_v37  ;;  %360 = vst.msk [vmem:[#allocation2 + $0x38] sm:$0xff] %vm352_vm3, %v351_v38 }
  0xfd   : > { %354 = vst.msk [vmem:[#allocation2 + $0x8] sm:$0xff] %vm352_vm3, %v345_v41  ;;  %358 = vst.msk [vmem:[#allocation2 + $0x28] sm:$0xff] %vm352_vm3, %v349_v42 }
  0xff   : > { %v877_v43 = vpop.f32.mrb[4].mxu1  ;;  %v887_v44 = vpop.f32.mrb[4].mxu0 }
 0x100   : > { %v458_v45 = vpop.f32.mrb[5].mxu1  ;;  %v602_v46 = vpop.f32.mrb[5].mxu0 }
 0x101   : > { %v378_v47 = vld [vmem:[#allocation2 + $0x10] sm:$0xff]  ;;  %v878_v48 = vpop.f32.mrb[6].mxu1  ;;  %v888_v49 = vpop.f32.mrb[6].mxu0 }
 0x102   : > { %v491_v50 = vadd.f32 %v877_v43, %v378_v47  ;;  %v376_v51 = vld [vmem:[#allocation2] sm:$0xff]  ;;  %v461_v52 = vpop.f32.mrb[7].mxu1  ;;  %v605_v53 = vpop.f32.mrb[7].mxu0  ;;  %v382_v59 = vld [vmem:[#allocation2 + $0x30] sm:$0xff] }
 0x103   : > { %v489_v54 = vadd.f32 %v458_v45, %v376_v51  ;;  %v379_v55 = vld [vmem:[#allocation2 + $0x18] sm:$0xff]  ;;  %v380_v63 = vld [vmem:[#allocation2 + $0x20] sm:$0xff] }
 0x104   : > { %499 = vst.msk [vmem:[#allocation2 + $0x10] sm:$0xff] %vm352_vm3, %v491_v50  ;;  %v492_v56 = vadd.f32 %v878_v48, %v379_v55  ;;  %v377_v57 = vld [vmem:[#allocation2 + $0x8] sm:$0xff]  ;;  %v383_v3 = vld [vmem:[#allocation2 + $0x38] sm:$0xff] }
 0x105   : > { %497 = vst.msk [vmem:[#allocation2] sm:$0xff] %vm352_vm3, %v489_v54  ;;  %v490_v58 = vadd.f32 %v461_v52, %v377_v57  ;;  %v381_v7 = vld [vmem:[#allocation2 + $0x28] sm:$0xff] }
 0x106   : > { %500 = vst.msk [vmem:[#allocation2 + $0x18] sm:$0xff] %vm352_vm3, %v492_v56 }
 0x107   : > { %498 = vst.msk [vmem:[#allocation2 + $0x8] sm:$0xff] %vm352_vm3, %v490_v58  ;;  %v881_v60 = vpop.f32.mrb[8].mxu1  ;;  %v891_v61 = vpop.f32.mrb[8].mxu0 }
 0x108   : > { %v495_v62 = vadd.f32 %v881_v60, %v382_v59  ;;  %v474_v0 = vpop.f32.mrb[9].mxu1  ;;  %v618_v1 = vpop.f32.mrb[9].mxu0 }
 0x109   : > { %v493_v2 = vadd.f32 %v474_v0, %v380_v63  ;;  %v882_v4 = vpop.f32.mrb[10].mxu1  ;;  %v892_v5 = vpop.f32.mrb[10].mxu0 }
 0x10a   : > { %503 = vst.msk [vmem:[#allocation2 + $0x30] sm:$0xff] %vm352_vm3, %v495_v62  ;;  %v496_v6 = vadd.f32 %v882_v4, %v383_v3  ;;  %v477_v8 = vpop.f32.mrb[11].mxu1  ;;  %v621_v9 = vpop.f32.mrb[11].mxu0 }
 0x10b   : > { %v522_v10 = vld [vmem:[#allocation2 + $0x10] sm:$0xff]  ;;  %501 = vst.msk [vmem:[#allocation2 + $0x20] sm:$0xff] %vm352_vm3, %v493_v2  ;;  %v494_v11 = vadd.f32 %v477_v8, %v381_v7 }
 0x10c   : > { %v635_v12 = vadd.f32 %v887_v44, %v522_v10  ;;  %v520_v13 = vld [vmem:[#allocation2] sm:$0xff]  ;;  %504 = vst.msk [vmem:[#allocation2 + $0x38] sm:$0xff] %vm352_vm3, %v496_v6 }
 0x10d   : > { %v633_v14 = vadd.f32 %v602_v46, %v520_v13  ;;  %v523_v15 = vld [vmem:[#allocation2 + $0x18] sm:$0xff]  ;;  %502 = vst.msk [vmem:[#allocation2 + $0x28] sm:$0xff] %vm352_vm3, %v494_v11 }
 0x10e   : > { %643 = vst.msk [vmem:[#allocation2 + $0x10] sm:$0xff] %vm352_vm3, %v635_v12  ;;  %v636_v16 = vadd.f32 %v888_v49, %v523_v15  ;;  %v521_v17 = vld [vmem:[#allocation2 + $0x8] sm:$0xff] }
 0x10f   : > { %641 = vst.msk [vmem:[#allocation2] sm:$0xff] %vm352_vm3, %v633_v14  ;;  %v634_v18 = vadd.f32 %v605_v53, %v521_v17 }
 0x110   : > { %644 = vst.msk [vmem:[#allocation2 + $0x18] sm:$0xff] %vm352_vm3, %v636_v16 }
 0x111   : > { %642 = vst.msk [vmem:[#allocation2 + $0x8] sm:$0xff] %vm352_vm3, %v634_v18  ;;  %v526_v19 = vld [vmem:[#allocation2 + $0x30] sm:$0xff]  ;;  %652 = sbr.rel (%p844_p10) target bundleno = 288 (0x120), region = 36 }
 0x112   : > { %v639_v20 = vadd.f32 %v891_v61, %v526_v19  ;;  %v524_v21 = vld [vmem:[#allocation2 + $0x20] sm:$0xff] }
 0x113   : > { %v637_v22 = vadd.f32 %v618_v1, %v524_v21  ;;  %v527_v23 = vld [vmem:[#allocation2 + $0x38] sm:$0xff] }
 0x114   : > { %647 = vst.msk [vmem:[#allocation2 + $0x30] sm:$0xff] %vm352_vm3, %v639_v20  ;;  %v640_v24 = vadd.f32 %v892_v5, %v527_v23  ;;  %v525_v25 = vld [vmem:[#allocation2 + $0x28] sm:$0xff] }
 0x115   : > { %645 = vst.msk [vmem:[#allocation2 + $0x20] sm:$0xff] %vm352_vm3, %v637_v22  ;;  %v638_v26 = vadd.f32 %v621_v9, %v525_v25  ;;  %v655_v29 = vld [vmem:[#allocation2 + $0x10] sm:$0xff] (!%p844_p10) }
 0x116   : > { %648 = vst.msk [vmem:[#allocation2 + $0x38] sm:$0xff] %vm352_vm3, %v640_v24  ;;  %v653_v27 = vld [vmem:[#allocation2] sm:$0xff] (!%p844_p10)  ;;  %663 = vst.msk [vmem:[%s1103_s6 + $0x10] sm:$0xff] (!%p844_p10), %vm352_vm3, %v655_v29 }
 0x117   : > { %646 = vst.msk [vmem:[#allocation2 + $0x28] sm:$0xff] %vm352_vm3, %v638_v26  ;;  %661 = vst.msk [vmem:[%s1103_s6] sm:$0xff] (!%p844_p10), %vm352_vm3, %v653_v27  ;;  %v656_v30 = vld [vmem:[#allocation2 + $0x18] sm:$0xff] (!%p844_p10) }
 0x118   : > { %v654_v28 = vld [vmem:[#allocation2 + $0x8] sm:$0xff]  ;;  %664 = vst.msk [vmem:[%s1103_s6 + $0x18] sm:$0xff] %vm352_vm3, %v656_v30 }
 0x119   : > { %662 = vst.msk [vmem:[%s1103_s6 + $0x8] sm:$0xff] %vm352_vm3, %v654_v28 }
 0x11b   : > { %v659_v33 = vld [vmem:[#allocation2 + $0x30] sm:$0xff] }
 0x11c   : > { %v657_v31 = vld [vmem:[#allocation2 + $0x20] sm:$0xff]  ;;  %667 = vst.msk [vmem:[%s1103_s6 + $0x30] sm:$0xff] %vm352_vm3, %v659_v33 }
 0x11d   : > { %665 = vst.msk [vmem:[%s1103_s6 + $0x20] sm:$0xff] %vm352_vm3, %v657_v31  ;;  %v660_v34 = vld [vmem:[#allocation2 + $0x38] sm:$0xff] }
 0x11e   : > { %v658_v32 = vld [vmem:[#allocation2 + $0x28] sm:$0xff]  ;;  %668 = vst.msk [vmem:[%s1103_s6 + $0x38] sm:$0xff] %vm352_vm3, %v660_v34 }
 0x11f   : > { %666 = vst.msk [vmem:[%s1103_s6 + $0x28] sm:$0xff] %vm352_vm3, %v658_v32 }
 0x120 PF: > { %s12_s15 = sadd.s32 1, %s1027_s15   ;;  %s1206_s9 = smov %s1015_s12 }
 0x121   : > { %p9_p11 = scmp.ge.s32.totalorder %s12_s15, 50   ;;  %s1207_s10 = smov %s1019_s13 }
 0x122   : > { %s1208_s11 = smov %s1023_s14  ;;  %s1209_s12 = smov %s1213_s16 }
 0x123   : > { %s1210_s13 = smov %s1217_s17  ;;  %s1211_s14 = smov %s1221_s18 }
 0x124   :  { %11 = sbr.rel (!%p9_p11) target bundleno = 4 (0x4), region = 71 }

// kernel: downsampling_forward.1
= control target key start
LH: loop header
LB: loop body
LE: loop exit
PB: predicated region body
PF: predicated region fallthrough
CT: control target
= control target key end

     0   :  { %s1045_s9 = smov 0   ;;  %s1047_s10 = smov 0   ;;  %s1203_s0 = inlined_call_operand.vmem [shape: bf16[2,18,9,2,8,12], index: 0, kind: input, shape index: {}]   ;;  %s1204_s1 = inlined_call_operand.vmem [shape: bf16[9,12,8], index: 1, kind: input, shape index: {}]   ;;  %s1205_s2 = inlined_call_operand.vmem [shape: f32[2,8,64,8], index: 2, kind: output, shape index: {}]  }
   0x1   :  { %s1049_s11 = smov 0   ;;  %s1051_s12 = smov 0  }
   0x2   :  { %s1053_s13 = smov 0   ;;  %s1055_s14 = smov 0  }
   0x3   :  { %s1057_s15 = smov 0  }
   0x4 LB: > { %s24_s16 = sadd.s32 1, %s1015_s12  ;;  %s27_s17 = sadd.s32 1, %s1019_s13  ;;  %s1027_s15 = sphi %s1057_s15, %s12_s15   ;;  %s1023_s14 = sphi %s1055_s14, %s1211_s14   ;;  %s1019_s13 = sphi %s1053_s13, %s1210_s13   ;;  %s1015_s12 = sphi %s1051_s12, %s1209_s12   ;;  %s1011_s11 = sphi %s1049_s11, %s1208_s11   ;;  %s1007_s10 = sphi %s1047_s10, %s1207_s10   ;;  %s1003_s9 = sphi %s1045_s9, %s1206_s9  }
   0x5   : > { %p25_p0 = scmp.ge.s32.totalorder %s24_s16, 3  ;;  %p786_p1 = scmp.ge.s32.totalorder %s1027_s15, 1 }
   0x6   : > { %p147_p2 = scmp.lt.s32.totalorder %s1027_s15, 49  ;;  %s31_s18 = sadd.s32 1, %s1023_s14 }
   0x7   : > { %s1213_s16 = smov (%p25_p0, %s24_s16), 0  ;;  %s1215_s17 = smov (!%p25_p0, %s27_s17), %s1019_s13 }
   0x8   : > { %p148_p3 = pnand %p786_p1, %p147_p2  ;;  %p29_p4 = scmp.ge.s32.totalorder %s1215_s17, 8 }
   0x9   : > { %s787_s19 = sshll.u32 (!%p148_p3), %s1007_s10, 1  ;;  %p181_p6 = scmp.lt.s32.totalorder (!%p148_p3), %s1011_s11, 1 }
   0xa   : > { %s1217_s17 = smov (%p29_p4, %s1215_s17), 0  ;;  %s1219_s18 = smov (!%p29_p4, %s31_s18), %s1023_s14 }
   0xb   : > { %p33_p5 = scmp.ge.s32.totalorder %s1219_s18, 2  ;;  %151 = sbr.rel (%p148_p3) target bundleno = 288 (0x120), region = 28 }
   0xc   : > { %s180_s20 = sadd.s32 (!%p148_p3), %s1003_s9, %s787_s19  ;;  %p194_p7 = scmp.lt.s32.totalorder (!%p148_p3), %s1007_s10, 7 }
   0xd   : > { %s1221_s18 = smov (%p33_p5, %s1219_s18), 0  ;;  %p183_p8 = scmp.lt.s32.totalorder (!%p148_p3), %s180_s20, 17 }
   0xe   : > { %p792_p9 = scmp.ne.s32.totalorder (!%p148_p3), %s1003_s9, 0 }
  0x12   : > { %s1223_s11 = smov (!%p181_p6, %s1011_s11), 1  ;;  %s1225_s20 = smov (!%p183_p8, %s180_s20), 17 }
  0x13   : > { %s900_s21 = smul.u32 324, %s1223_s11  ;;  %s790_s22 = sshll.u32 %s1223_s11, 6  ;;  %vm206_vm0 = vcmask (!%p792_p9), 64512   ;;  %v1029_v0 = vmov (!%p792_p9), 0.0  }
  0x14   : > { %s1227_s10 = smov (!%p194_p7, %s1007_s10), 7  ;;  %s899_s23 = smul.u32 18, %s1225_s20  ;;  %207 = vst.msk [vmem:[#allocation2] sm:$0xff] (!%p792_p9), %vm206_vm0, %v1029_v0  ;;  %208 = vst.msk [vmem:[#allocation2 + $0x8] sm:$0xff] (!%p792_p9), %vm206_vm0, %v1029_v0 }
  0x15   : > { %s789_s24 = sshll.u32 %s1227_s10, 3  ;;  %205 = sbr.rel (%p792_p9) target bundleno = 28 (0x1c), region = 32  ;;  %209 = vst.msk [vmem:[#allocation2 + $0x10] sm:$0xff] (!%p792_p9), %vm206_vm0, %v1029_v0  ;;  %210 = vst.msk [vmem:[#allocation2 + $0x18] sm:$0xff] (!%p792_p9), %vm206_vm0, %v1029_v0 }
  0x16   : > { %s187_s25 = sadd.s32 %s900_s21, %s899_s23  ;;  %s198_s26 = sadd.s32 %s790_s22, %s789_s24  ;;  %211 = vst.msk [vmem:[#allocation2 + $0x20] sm:$0xff] (!%p792_p9), %vm206_vm0, %v1029_v0  ;;  %212 = vst.msk [vmem:[#allocation2 + $0x28] sm:$0xff] (!%p792_p9), %vm206_vm0, %v1029_v0 }
  0x17   : > { %s788_s27 = sshll.u32 %s187_s25, 2  ;;  %s791_s28 = sshll.u32 %s198_s26, 3  ;;  %213 = vst.msk [vmem:[#allocation2 + $0x30] sm:$0xff] (!%p792_p9), %vm206_vm0, %v1029_v0  ;;  %214 = vst.msk [vmem:[#allocation2 + $0x38] sm:$0xff] (!%p792_p9), %vm206_vm0, %v1029_v0 }
  0x18   : > { %s1098_s3 = scalar_lea.vmem %s1203_s0, %s788_s27  ;;  %s1103_s6 = scalar_lea.vmem %s1205_s2, %s791_s28 }
  0x1c PF: > { %s847_s7 = smul.u32 24, %s1003_s9  ;;  %vm275_vm1 = vcmask 1045504   ;;  %v959_v1 = vld [vmem:[%s1098_s3] ss:$8 sps:$4 sm:$0xff]   ;;  %vm262_vm2 = vcmask 97280   ;;  %v231_v19 = vld [vmem:[#allocation2 + $0x10] sm:$0xff] }
  0x1d   : > { %v960_v2 = vld [vmem:[%s1098_s3 + $0x20] ss:$8 sps:$4 sm:$0xff]   ;;  %865 = vmatprep.mubr.msk.bf16.mxu0 %vm262_vm2, %v959_v1  ;;  %v961_v4 = vld [vmem:[%s1098_s3 + $0x10] ss:$8 sps:$4 sm:$0xff]   ;;  %v964_v8 = vld [vmem:[%s1098_s3 + $0x4] ss:$8 sps:$4 sm:$0xff]  }
  0x1e   : > { %s226_s11 = scalar_lea.vmem %s1204_s1, %s847_s7  ;;  %869 = vmatprep.mubr.msk.bf16.mxu1 %vm262_vm2, %v960_v2  ;;  %v962_v6 = vld [vmem:[%s1098_s3 + $0x30] ss:$8 sps:$4 sm:$0xff]   ;;  %v965_v11 = vld [vmem:[%s1098_s3 + $0x14] ss:$8 sps:$4 sm:$0xff]   ;;  %v967_v14 = vld [vmem:[%s1098_s3 + $0x24] ss:$8 sps:$4 sm:$0xff]  }
  0x1f   : > { %v958_v3 = vld [vmem:[%s226_s11] sm:$0x3f]   ;;  %v963_v7 = vld [vmem:[%s226_s11 + $0x8] sm:$0x3f]   ;;  %v966_v10 = vld [vmem:[%s226_s11 + $0x10] sm:$0x3f]  }
  0x20   : > { %895 = vmatprep.subr.msk.bf16.mxu0 %vm275_vm1, %v958_v3  ;;  %896 = vmatprep.subr.msk.bf16.mxu1 %vm275_vm1, %v958_v3  ;;  %v277_v5 = vsel %vm275_vm1, %v958_v3, 0  ;;  %v422_v9 = vsel %vm275_vm1, %v963_v7, 0  ;;  %v566_v12 = vsel %vm275_vm1, %v966_v10, 0  ;;  %v968_v13 = vld [vmem:[%s1098_s3 + $0x8] ss:$8 sps:$4 sm:$0xff]   ;;  %v229_v21 = vld [vmem:[#allocation2] sm:$0xff] }
  0x21   : > { %864 = vmatpush3.bf16.msra.mxu0 %v277_v5  ;;  %894 = vmatpush3.bf16.msra.mxu1 %v277_v5  ;;  %v970_v15 = vld [vmem:[%s1098_s3 + $0x18] ss:$8 sps:$4 sm:$0xff]   ;;  %v971_v16 = vld [vmem:[%s1098_s3 + $0x28] ss:$8 sps:$4 sm:$0xff]   ;;  %v969_v17 = vld [vmem:[%s1098_s3 + $0x34] ss:$8 sps:$4 sm:$0xff]  }
  0x22   : > { %897 = vmatprep.subr.msk.bf16.mxu1 %vm275_vm1, %v963_v7  ;;  %898 = vmatprep.subr.msk.bf16.mxu0 %vm275_vm1, %v966_v10  ;;  %v972_v18 = vld [vmem:[%s1098_s3 + $0x38] ss:$8 sps:$4 sm:$0xff]   ;;  %v235_v20 = vld [vmem:[#allocation2 + $0x30] sm:$0xff]  ;;  %vm352_vm3 = vcmask 64512   ;;  %v230_v31 = vld [vmem:[#allocation2 + $0x8] sm:$0xff]  ;;  %p844_p10 = scmp.ne.s32.totalorder %s1003_s9, 2 }
  0x23   : > { %v233_v22 = vld [vmem:[#allocation2 + $0x20] sm:$0xff]  ;;  %v232_v25 = vld [vmem:[#allocation2 + $0x18] sm:$0xff]  ;;  %v234_v32 = vld [vmem:[#allocation2 + $0x28] sm:$0xff] }
  0x24   : > { %866 = vmatmul.mubr.msk.bf16.vlgmr.msra.gmra.mrb[0].mxu0 %vm262_vm2, %v961_v4  ;;  %870 = vmatmul.mubr.msk.bf16.vlgmr.msra.gmra.mrb[0].mxu1 %vm262_vm2, %v962_v6  ;;  %v236_v26 = vld [vmem:[#allocation2 + $0x38] sm:$0xff] }
  0x25   : > { %874 = vmatpush3.bf16.msra.mxu1 %v422_v9  ;;  %875 = vmatprep.mubr.msk.bf16.mxu1 %vm262_vm2, %v964_v8 }
  0x26   : > { %884 = vmatpush3.bf16.msra.mxu0 %v566_v12  ;;  %885 = vmatprep.mubr.msk.bf16.mxu0 %vm262_vm2, %v968_v13 }
  0x2c   : > { %876 = vmatmul.mubr.msk.bf16.vlgmr.msra.gmra.mrb[4].mxu1 %vm262_vm2, %v965_v11  ;;  %886 = vmatmul.mubr.msk.bf16.vlgmr.msra.gmra.mrb[4].mxu0 %vm262_vm2, %v970_v15 }
  0x2d   : > { %879 = vmatprep.mubr.msk.bf16.mxu1 %vm262_vm2, %v967_v14  ;;  %889 = vmatprep.mubr.msk.bf16.mxu0 %vm262_vm2, %v971_v16 }
  0x34   : > { %880 = vmatmul.mubr.msk.bf16.gmra.mrb[8].mxu1 %vm262_vm2, %v969_v17  ;;  %890 = vmatmul.mubr.msk.bf16.gmra.mrb[8].mxu0 %vm262_vm2, %v972_v18 }
  0xf7   : > { %v867_v23 = vpop.f32.mrb[0].mxu0  ;;  %v871_v24 = vpop.f32.mrb[0].mxu1 }
  0xf8   : > { %v346_v27 = vadd.f32 %v867_v23, %v231_v19  ;;  %v350_v28 = vadd.f32 %v871_v24, %v235_v20  ;;  %v313_v29 = vpop.f32.mrb[1].mxu0  ;;  %v329_v30 = vpop.f32.mrb[1].mxu1 }
  0xf9   : > { %v344_v33 = vadd.f32 %v313_v29, %v229_v21  ;;  %v348_v34 = vadd.f32 %v329_v30, %v233_v22  ;;  %v868_v35 = vpop.f32.mrb[2].mxu0  ;;  %v872_v36 = vpop.f32.mrb[2].mxu1 }
  0xfa   : > { %355 = vst.msk [vmem:[#allocation2 + $0x10] sm:$0xff] %vm352_vm3, %v346_v27  ;;  %359 = vst.msk [vmem:[#allocation2 + $0x30] sm:$0xff] %vm352_vm3, %v350_v28  ;;  %v347_v37 = vadd.f32 %v868_v35, %v232_v25  ;;  %v351_v38 = vadd.f32 %v872_v36, %v236_v26  ;;  %v316_v39 = vpop.f32.mrb[3].mxu0  ;;  %v332_v40 = vpop.f32.mrb[3].mxu1 }
  0xfb   : > { %353 = vst.msk [vmem:[#allocation2] sm:$0xff] %vm352_vm3, %v344_v33  ;;  %357 = vst.msk [vmem:[#allocation2 + $0x20] sm:$0xff] %vm352_vm3, %v348_v34  ;;  %v345_v41 = vadd.f32 %v316_v39, %v230_v31  ;;  %v349_v42 = vadd.f32 %v332_v40, %v234_v32 }
  0xfc   : > { %356 = vst.msk [vmem:[#allocation2 + $0x18] sm:$0xff] %vm352_vm3, %v347_v37  ;;  %360 = vst.msk [vmem:[#allocation2 + $0x38] sm:$0xff] %vm352_vm3, %v351_v38 }
  0xfd   : > { %354 = vst.msk [vmem:[#allocation2 + $0x8] sm:$0xff] %vm352_vm3, %v345_v41  ;;  %358 = vst.msk [vmem:[#allocation2 + $0x28] sm:$0xff] %vm352_vm3, %v349_v42 }
  0xff   : > { %v877_v43 = vpop.f32.mrb[4].mxu1  ;;  %v887_v44 = vpop.f32.mrb[4].mxu0 }
 0x100   : > { %v458_v45 = vpop.f32.mrb[5].mxu1  ;;  %v602_v46 = vpop.f32.mrb[5].mxu0 }
 0x101   : > { %v378_v47 = vld [vmem:[#allocation2 + $0x10] sm:$0xff]  ;;  %v878_v48 = vpop.f32.mrb[6].mxu1  ;;  %v888_v49 = vpop.f32.mrb[6].mxu0 }
 0x102   : > { %v491_v50 = vadd.f32 %v877_v43, %v378_v47  ;;  %v376_v51 = vld [vmem:[#allocation2] sm:$0xff]  ;;  %v461_v52 = vpop.f32.mrb[7].mxu1  ;;  %v605_v53 = vpop.f32.mrb[7].mxu0  ;;  %v382_v59 = vld [vmem:[#allocation2 + $0x30] sm:$0xff] }
 0x103   : > { %v489_v54 = vadd.f32 %v458_v45, %v376_v51  ;;  %v379_v55 = vld [vmem:[#allocation2 + $0x18] sm:$0xff]  ;;  %v380_v63 = vld [vmem:[#allocation2 + $0x20] sm:$0xff] }
 0x104   : > { %499 = vst.msk [vmem:[#allocation2 + $0x10] sm:$0xff] %vm352_vm3, %v491_v50  ;;  %v492_v56 = vadd.f32 %v878_v48, %v379_v55  ;;  %v377_v57 = vld [vmem:[#allocation2 + $0x8] sm:$0xff]  ;;  %v383_v3 = vld [vmem:[#allocation2 + $0x38] sm:$0xff] }
 0x105   : > { %497 = vst.msk [vmem:[#allocation2] sm:$0xff] %vm352_vm3, %v489_v54  ;;  %v490_v58 = vadd.f32 %v461_v52, %v377_v57  ;;  %v381_v7 = vld [vmem:[#allocation2 + $0x28] sm:$0xff] }
 0x106   : > { %500 = vst.msk [vmem:[#allocation2 + $0x18] sm:$0xff] %vm352_vm3, %v492_v56 }
 0x107   : > { %498 = vst.msk [vmem:[#allocation2 + $0x8] sm:$0xff] %vm352_vm3, %v490_v58  ;;  %v881_v60 = vpop.f32.mrb[8].mxu1  ;;  %v891_v61 = vpop.f32.mrb[8].mxu0 }
 0x108   : > { %v495_v62 = vadd.f32 %v881_v60, %v382_v59  ;;  %v474_v0 = vpop.f32.mrb[9].mxu1  ;;  %v618_v1 = vpop.f32.mrb[9].mxu0 }
 0x109   : > { %v493_v2 = vadd.f32 %v474_v0, %v380_v63  ;;  %v882_v4 = vpop.f32.mrb[10].mxu1  ;;  %v892_v5 = vpop.f32.mrb[10].mxu0 }
 0x10a   : > { %503 = vst.msk [vmem:[#allocation2 + $0x30] sm:$0xff] %vm352_vm3, %v495_v62  ;;  %v496_v6 = vadd.f32 %v882_v4, %v383_v3  ;;  %v477_v8 = vpop.f32.mrb[11].mxu1  ;;  %v621_v9 = vpop.f32.mrb[11].mxu0 }
 0x10b   : > { %v522_v10 = vld [vmem:[#allocation2 + $0x10] sm:$0xff]  ;;  %501 = vst.msk [vmem:[#allocation2 + $0x20] sm:$0xff] %vm352_vm3, %v493_v2  ;;  %v494_v11 = vadd.f32 %v477_v8, %v381_v7 }
 0x10c   : > { %v635_v12 = vadd.f32 %v887_v44, %v522_v10  ;;  %v520_v13 = vld [vmem:[#allocation2] sm:$0xff]  ;;  %504 = vst.msk [vmem:[#allocation2 + $0x38] sm:$0xff] %vm352_vm3, %v496_v6 }
 0x10d   : > { %v633_v14 = vadd.f32 %v602_v46, %v520_v13  ;;  %v523_v15 = vld [vmem:[#allocation2 + $0x18] sm:$0xff]  ;;  %502 = vst.msk [vmem:[#allocation2 + $0x28] sm:$0xff] %vm352_vm3, %v494_v11 }
 0x10e   : > { %643 = vst.msk [vmem:[#allocation2 + $0x10] sm:$0xff] %vm352_vm3, %v635_v12  ;;  %v636_v16 = vadd.f32 %v888_v49, %v523_v15  ;;  %v521_v17 = vld [vmem:[#allocation2 + $0x8] sm:$0xff] }
 0x10f   : > { %641 = vst.msk [vmem:[#allocation2] sm:$0xff] %vm352_vm3, %v633_v14  ;;  %v634_v18 = vadd.f32 %v605_v53, %v521_v17 }
 0x110   : > { %644 = vst.msk [vmem:[#allocation2 + $0x18] sm:$0xff] %vm352_vm3, %v636_v16 }
 0x111   : > { %642 = vst.msk [vmem:[#allocation2 + $0x8] sm:$0xff] %vm352_vm3, %v634_v18  ;;  %v526_v19 = vld [vmem:[#allocation2 + $0x30] sm:$0xff]  ;;  %652 = sbr.rel (%p844_p10) target bundleno = 288 (0x120), region = 36 }
 0x112   : > { %v639_v20 = vadd.f32 %v891_v61, %v526_v19  ;;  %v524_v21 = vld [vmem:[#allocation2 + $0x20] sm:$0xff] }
 0x113   : > { %v637_v22 = vadd.f32 %v618_v1, %v524_v21  ;;  %v527_v23 = vld [vmem:[#allocation2 + $0x38] sm:$0xff] }
 0x114   : > { %647 = vst.msk [vmem:[#allocation2 + $0x30] sm:$0xff] %vm352_vm3, %v639_v20  ;;  %v640_v24 = vadd.f32 %v892_v5, %v527_v23  ;;  %v525_v25 = vld [vmem:[#allocation2 + $0x28] sm:$0xff] }
 0x115   : > { %645 = vst.msk [vmem:[#allocation2 + $0x20] sm:$0xff] %vm352_vm3, %v637_v22  ;;  %v638_v26 = vadd.f32 %v621_v9, %v525_v25  ;;  %v655_v29 = vld [vmem:[#allocation2 + $0x10] sm:$0xff] (!%p844_p10) }
 0x116   : > { %648 = vst.msk [vmem:[#allocation2 + $0x38] sm:$0xff] %vm352_vm3, %v640_v24  ;;  %v653_v27 = vld [vmem:[#allocation2] sm:$0xff] (!%p844_p10)  ;;  %663 = vst.msk [vmem:[%s1103_s6 + $0x10] sm:$0xff] (!%p844_p10), %vm352_vm3, %v655_v29 }
 0x117   : > { %646 = vst.msk [vmem:[#allocation2 + $0x28] sm:$0xff] %vm352_vm3, %v638_v26  ;;  %661 = vst.msk [vmem:[%s1103_s6] sm:$0xff] (!%p844_p10), %vm352_vm3, %v653_v27  ;;  %v656_v30 = vld [vmem:[#allocation2 + $0x18] sm:$0xff] (!%p844_p10) }
 0x118   : > { %v654_v28 = vld [vmem:[#allocation2 + $0x8] sm:$0xff]  ;;  %664 = vst.msk [vmem:[%s1103_s6 + $0x18] sm:$0xff] %vm352_vm3, %v656_v30 }
 0x119   : > { %662 = vst.msk [vmem:[%s1103_s6 + $0x8] sm:$0xff] %vm352_vm3, %v654_v28 }
 0x11b   : > { %v659_v33 = vld [vmem:[#allocation2 + $0x30] sm:$0xff] }
 0x11c   : > { %v657_v31 = vld [vmem:[#allocation2 + $0x20] sm:$0xff]  ;;  %667 = vst.msk [vmem:[%s1103_s6 + $0x30] sm:$0xff] %vm352_vm3, %v659_v33 }
 0x11d   : > { %665 = vst.msk [vmem:[%s1103_s6 + $0x20] sm:$0xff] %vm352_vm3, %v657_v31  ;;  %v660_v34 = vld [vmem:[#allocation2 + $0x38] sm:$0xff] }
 0x11e   : > { %v658_v32 = vld [vmem:[#allocation2 + $0x28] sm:$0xff]  ;;  %668 = vst.msk [vmem:[%s1103_s6 + $0x38] sm:$0xff] %vm352_vm3, %v660_v34 }
 0x11f   : > { %666 = vst.msk [vmem:[%s1103_s6 + $0x28] sm:$0xff] %vm352_vm3, %v658_v32 }
 0x120 PF: > { %s12_s15 = sadd.s32 1, %s1027_s15   ;;  %s1206_s9 = smov %s1015_s12 }
 0x121   : > { %p9_p11 = scmp.ge.s32.totalorder %s12_s15, 50   ;;  %s1207_s10 = smov %s1019_s13 }
 0x122   : > { %s1208_s11 = smov %s1023_s14  ;;  %s1209_s12 = smov %s1213_s16 }
 0x123   : > { %s1210_s13 = smov %s1217_s17  ;;  %s1211_s14 = smov %s1221_s18 }
 0x124   :  { %11 = sbr.rel (!%p9_p11) target bundleno = 4 (0x4), region = 71 }

</bundles_post_ra>
